<compile_context>
chip_gen: v5e
topology: v5e:2x2
jax: 0.10.0
libtpu: 0.0.40
codegen_flags: <defaults>
</compile_context>

<pallas_src>
import jax
import jax.numpy as jnp
from jax.experimental import pallas as pl
from jax.experimental.pallas import tpu as pltpu

LANE = 128
HIDDEN = 256


def _round_up(n, m):
    return ((n + m - 1) // m) * m


def _cdiv(a, b):
    return (a + b - 1) // b


def mlp_kernel(x_ref, w1_ref, b1_ref, w2_ref, b2_ref, o_ref):
    # x_ref:  (1, TB)      batch samples along lanes
    # w1_ref: (256, 128)   lane-replicated first-layer weights (VMEM resident)
    # b1_ref: (256, 128)   lane-replicated first-layer bias
    # w2_ref: (256, 128)   lane-replicated second-layer weights
    # b2_ref: (1, 1)       SMEM scalar
    # o_ref:  (1, TB)
    tb = x_ref.shape[1]
    b2 = b2_ref[0, 0]

    # Process one 128-lane batch column (one vreg width) at a time: keeps the
    # live hidden tensor at ~32 vregs, so nothing spills onto the store slot.
    for j in range(tb // LANE):
        col = j * LANE                              # static python offset
        x_col = x_ref[:, pl.ds(col, LANE)]          # (1, 128); the (1,128)->(256,128)
                                                    # sublane broadcast is a single
                                                    # replicated-layout vreg op.
        h = jnp.maximum(w1_ref[...] * x_col + b1_ref[...], 0.0)   # (256, 128) VPU
        y = jnp.sum(h * w2_ref[...], axis=0, keepdims=True)       # (1, 128) sublane reduce
        o_ref[:, pl.ds(col, LANE)] = (y + b2).astype(o_ref.dtype)


def sine_approximator_forward(x, w1, b1, w2, b2, *, tile_b=2048):
    """x: (B, 1) or (B,) float32 -> (B, 1) float32.

    w1: (256, 1), b1: (256,), w2: (1, 256), b2: (1,)  (PyTorch nn.Linear shapes).
    """
    x = jnp.asarray(x, jnp.float32)
    B = x.shape[0]
    x_flat = x.reshape(B)

    # Lane-dense batch layout. Tile the batch; keep >= 2 grid steps whenever the
    # batch spans >= 2 lane columns so the "parallel" axis can shard across the
    # two TensorCores on v7x (no effect on v5e/v6e).
    b128 = _round_up(B, LANE)
    tb = min(_round_up(tile_b, LANE), b128)
    if b128 // LANE >= 2:
        tb = min(tb, _round_up(_cdiv(b128, 2), LANE))
    tb = max(tb, LANE)
    Bp = _round_up(b128, tb)

    x_row = jnp.pad(x_flat, (0, Bp - B)).reshape(1, Bp)

    # Lane-replicated (256, 128) weight tiles (384 KiB total, VMEM-resident).
    w1b = jnp.broadcast_to(jnp.asarray(w1, jnp.float32).reshape(HIDDEN, 1), (HIDDEN, LANE))
    b1b = jnp.broadcast_to(jnp.asarray(b1, jnp.float32).reshape(HIDDEN, 1), (HIDDEN, LANE))
    w2b = jnp.broadcast_to(jnp.asarray(w2, jnp.float32).reshape(HIDDEN, 1), (HIDDEN, LANE))
    b2s = jnp.asarray(b2, jnp.float32).reshape(1, 1)

    grid = (Bp // tb,)
    out_row = pl.pallas_call(
        mlp_kernel,
        out_shape=jax.ShapeDtypeStruct((1, Bp), jnp.float32),
        grid=grid,
        in_specs=[
            pl.BlockSpec((1, tb), lambda i: (0, i)),             # x tile, pipelined
            pl.BlockSpec((HIDDEN, LANE), lambda i: (0, 0)),      # w1 resident
            pl.BlockSpec((HIDDEN, LANE), lambda i: (0, 0)),      # b1 resident
            pl.BlockSpec((HIDDEN, LANE), lambda i: (0, 0)),      # w2 resident
            pl.BlockSpec(memory_space=pltpu.MemorySpace.SMEM),   # b2 scalar
        ],
        out_specs=pl.BlockSpec((1, tb), lambda i: (0, i)),       # lane-dense output
        compiler_params=pltpu.CompilerParams(
            dimension_semantics=("parallel",)),                   # shard grid on v7x's 2 TCs
    )(x_row, w1b, b1b, w2b, b2s)

    return out_row[0, :B].reshape(B, 1)


def init_params(key):
    """Deterministic init mimicking nn.Linear defaults: U(-1/sqrt(fan_in), 1/sqrt(fan_in)).

    Returned in PyTorch shapes: w1 (256,1), b1 (256,), w2 (1,256), b2 (1,).
    """
    k1, k2, k3, k4 = jax.random.split(key, 4)
    # Linear(1, 256): fan_in = 1
    bound1 = 1.0
    w1 = jax.random.uniform(k1, (HIDDEN, 1), jnp.float32, -bound1, bound1)
    b1 = jax.random.uniform(k2, (HIDDEN,), jnp.float32, -bound1, bound1)
    # Linear(256, 1): fan_in = 256
    bound2 = 1.0 / jnp.sqrt(256.0)
    w2 = jax.random.uniform(k3, (1, HIDDEN), jnp.float32, -bound2, bound2)
    b2 = jax.random.uniform(k4, (1,), jnp.float32, -bound2, bound2)
    return w1, b1, w2, b2


def _reference(x, w1, b1, w2, b2):
    return jnp.maximum(x @ w1.T + b1, 0.0) @ w2.T + b2


if __name__ == "__main__":
    key = jax.random.PRNGKey(0)
    k_params, k_x = jax.random.split(key)
    w1, b1, w2, b2 = init_params(k_params)

    # Small batch (single 128-lane tile after padding).
    B = 8
    x = jax.random.uniform(k_x, (B, 1), jnp.float32, -jnp.pi, jnp.pi)
    out = sine_approximator_forward(x, w1, b1, w2, b2)
    jax.block_until_ready(out)
    ref = _reference(x, w1, b1, w2, b2)
    assert out.shape == (B, 1)
    assert jnp.allclose(out, ref, atol=1e-4, rtol=1e-5)

    # Multi-tile grid (>=2 steps) + ragged-tail padding path, default tile_b.
    B2 = 300
    x2 = jax.random.uniform(jax.random.PRNGKey(7), (B2, 1), jnp.float32, -jnp.pi, jnp.pi)
    out2 = sine_approximator_forward(x2, w1, b1, w2, b2)
    jax.block_until_ready(out2)
    ref2 = _reference(x2, w1, b1, w2, b2)
    assert out2.shape == (B2, 1)
    assert jnp.allclose(out2, ref2, atol=1e-4, rtol=1e-5)

    # Small explicit tile to exercise a 3-step grid with the inner column loop.
    out3 = sine_approximator_forward(x2, w1, b1, w2, b2, tile_b=128)
    jax.block_until_ready(out3)
    assert jnp.allclose(out3, ref2, atol=1e-4, rtol=1e-5)

    print("KERNEL_OK")
</pallas_src>

<mosaic_0001>
module attributes {stable_mosaic.version = 11 : i64} {
  func.func @mlp_kernel(%arg0: i32, %arg1: memref<1x128xf32, #tpu.memory_space<vmem>>, %arg2: memref<256x128xf32, #tpu.memory_space<vmem>>, %arg3: memref<256x128xf32, #tpu.memory_space<vmem>>, %arg4: memref<256x128xf32, #tpu.memory_space<vmem>>, %arg5: memref<1x1xf32, #tpu.memory_space<smem>>, %arg6: memref<1x128xf32, #tpu.memory_space<vmem>>) attributes {dimension_semantics = [#tpu.dimension_semantics<parallel>], iteration_bounds = array<i64: 1>, scalar_prefetch = 0 : i64, scratch_operands = 0 : i64, tpu.core_type = #tpu.core_type<tc>, window_params = [{transform_indices = @transform_0, window_bounds = array<i64: 1, 128>}, {pipeline_mode = #tpu.pipeline_mode<synchronous>, transform_indices = @transform_1, window_bounds = array<i64: 256, 128>}, {pipeline_mode = #tpu.pipeline_mode<synchronous>, transform_indices = @transform_2, window_bounds = array<i64: 256, 128>}, {pipeline_mode = #tpu.pipeline_mode<synchronous>, transform_indices = @transform_3, window_bounds = array<i64: 256, 128>}, {transform_indices = @transform_4, window_bounds = array<i64: 1, 1>}, {transform_indices = @transform_5, window_bounds = array<i64: 1, 128>}]} {
    %c0 = arith.constant 0 : index
    %c0_0 = arith.constant 0 : index
    %0 = memref.load %arg5[%c0, %c0_0] : memref<1x1xf32, #tpu.memory_space<smem>>
    %c0_1 = arith.constant 0 : index
    %c0_2 = arith.constant 0 : index
    %1 = vector.load %arg1[%c0_1, %c0_2] : memref<1x128xf32, #tpu.memory_space<vmem>>, vector<1x128xf32>
    %c0_3 = arith.constant 0 : index
    %c0_4 = arith.constant 0 : index
    %2 = vector.load %arg2[%c0_3, %c0_4] : memref<256x128xf32, #tpu.memory_space<vmem>>, vector<256x128xf32>
    %3 = vector.broadcast %1 : vector<1x128xf32> to vector<256x128xf32>
    %4 = arith.mulf %2, %3 : vector<256x128xf32>
    %c0_5 = arith.constant 0 : index
    %c0_6 = arith.constant 0 : index
    %5 = vector.load %arg3[%c0_5, %c0_6] : memref<256x128xf32, #tpu.memory_space<vmem>>, vector<256x128xf32>
    %6 = arith.addf %4, %5 : vector<256x128xf32>
    %cst = arith.constant 0.000000e+00 : f32
    %7 = vector.broadcast %cst : f32 to vector<256x128xf32>
    %8 = arith.maximumf %6, %7 : vector<256x128xf32>
    %c0_7 = arith.constant 0 : index
    %c0_8 = arith.constant 0 : index
    %9 = vector.load %arg4[%c0_7, %c0_8] : memref<256x128xf32, #tpu.memory_space<vmem>>, vector<256x128xf32>
    %10 = arith.mulf %8, %9 : vector<256x128xf32>
    %cst_9 = arith.constant dense<0.000000e+00> : vector<128xf32>
    %11 = vector.multi_reduction <add>, %10, %cst_9 [0] : vector<256x128xf32> to vector<128xf32>
    %12 = vector.shape_cast %11 : vector<128xf32> to vector<1x128xf32>
    %13 = vector.broadcast %0 : f32 to vector<1x128xf32>
    %14 = arith.addf %12, %13 : vector<1x128xf32>
    %c0_10 = arith.constant 0 : index
    %c0_11 = arith.constant 0 : index
    %15 = vector.load %arg6[%c0_10, %c0_11] : memref<1x128xf32, #tpu.memory_space<vmem>>, vector<1x128xf32>
    tpu.vector_store %arg6[%c0_10, %c0_11], %14 {strides = array<i32>} : memref<1x128xf32, #tpu.memory_space<vmem>>, vector<1x128xf32>,
    return
  }
  func.func @transform_0(%arg0: i32) -> (i32, i32) {
    %c0_i32 = arith.constant 0 : i32
    %c0_i32_0 = arith.constant 0 : i32
    return %c0_i32, %arg0 : i32, i32
  }
  func.func @transform_1(%arg0: i32) -> (i32, i32) {
    %c0_i32 = arith.constant 0 : i32
    %c0_i32_0 = arith.constant 0 : i32
    %c0_i32_1 = arith.constant 0 : i32
    return %c0_i32, %c0_i32_0 : i32, i32
  }
  func.func @transform_2(%arg0: i32) -> (i32, i32) {
    %c0_i32 = arith.constant 0 : i32
    %c0_i32_0 = arith.constant 0 : i32
    %c0_i32_1 = arith.constant 0 : i32
    return %c0_i32, %c0_i32_0 : i32, i32
  }
  func.func @transform_3(%arg0: i32) -> (i32, i32) {
    %c0_i32 = arith.constant 0 : i32
    %c0_i32_0 = arith.constant 0 : i32
    %c0_i32_1 = arith.constant 0 : i32
    return %c0_i32, %c0_i32_0 : i32, i32
  }
  func.func @transform_4(%arg0: i32) -> (i32, i32) {
    %c0_i32 = arith.constant 0 : i32
    %c0_i32_0 = arith.constant 0 : i32
    %c0_i32_1 = arith.constant 0 : i32
    return %c0_i32, %c0_i32_0 : i32, i32
  }
  func.func @transform_5(%arg0: i32) -> (i32, i32) {
    %c0_i32 = arith.constant 0 : i32
    %c0_i32_0 = arith.constant 0 : i32
    return %c0_i32, %arg0 : i32, i32
  }
}

</mosaic_0001>

<bundles_post_ra>
// kernel: tpu_custom_call.1
= control target key start
LH: loop header
LB: loop body
LE: loop exit
PB: predicated region body
PF: predicated region fallthrough
CT: control target
= control target key end

     0   :  { %11 = vsyncpa [#allocation4], 0  ;;  %s553_s0 = inlined_call_operand.vmem [shape: f32[1,128], index: 0, kind: input, shape index: {}]   ;;  %s554_s1 = inlined_call_operand.hbm [shape: f32[256,128], index: 1, kind: input, shape index: {}]   ;;  %s555_s2 = inlined_call_operand.hbm [shape: f32[256,128], index: 2, kind: input, shape index: {}]   ;;  %s556_s3 = inlined_call_operand.hbm [shape: f32[256,128], index: 3, kind: input, shape index: {}]   ;;  %s557_s4 = inlined_call_operand.<no memory space> [shape: f32[1,1], index: 4, kind: input, shape index: {}]   ;;  %s558_s5 = inlined_call_operand.hbm [shape: f32[1,128], index: 5, kind: output, shape index: {}]  }
   0x1   :  { %12 = vsyncpa [#allocation7], 0 }
   0x2   :  { %13 = vsyncpa [#allocation5], 0  ;;  %s33_s20 = sshll.u32 %s555_s2, 4  ;;  %s465_s21 = smov [#allocation6]   ;;  %s34_s20 = int_to_ptr.hbm [resolvable:$true] %s33_s20 }
   0x3   :  { %s35_s22 = sshll.u32 %s465_s21, 4  ;;  %s20_s25 = sshll.u32 %s554_s1, 4  ;;  %s36_s22 = int_to_ptr.vmem [resolvable:$true] %s35_s22  ;;  %s21_s25 = int_to_ptr.hbm [resolvable:$true] %s20_s25 }
   0x4   :  { %s466_s26 = smov 128   ;;  %s467_s27 = smov 8  }
   0x5   :  { %41 = dma.hbm_to_vmem [thread:$0]  %s34_s20, 4096, %s36_s22, [#allocation7], %s466_s26, %s466_s26, %s467_s27  }
   0x6   :  { %s468_s28 = smov [#allocation3]   ;;  %s46_s7 = sshll.u32 %s556_s3, 4  ;;  %s47_s7 = int_to_ptr.hbm [resolvable:$true] %s46_s7 }
   0x7   :  { %s22_s29 = sshll.u32 %s468_s28, 4  ;;  %s469_s2 = smov [#allocation8]   ;;  %s23_s29 = int_to_ptr.vmem [resolvable:$true] %s22_s29 }
   0x8   :  { %28 = dma.hbm_to_vmem [thread:$0]  %s21_s25, 4096, %s23_s29, [#allocation4], %s466_s26, %s466_s26, %s467_s27  }
   0x9   :  { %s48_s8 = sshll.u32 %s469_s2, 4  ;;  %s49_s8 = int_to_ptr.vmem [resolvable:$true] %s48_s8 }
   0xa   :  { %54 = dma.hbm_to_vmem [thread:$0]  %s47_s7, 4096, %s49_s8, [#allocation7], %s466_s26, %s466_s26, %s467_s27  }
   0xb   :  { %459 = dma.done.wait [#allocation4], 4096  }
   0xc   :  { %460 = vsyncadd [#allocation4], 4294963200 }
   0xd   :  { %461 = dma.done.wait [#allocation7], 8192  }
   0xe   :  { %462 = vsyncadd [#allocation7], 4294959104  ;;  %v513_v0 = vld [vmem:[%s553_s0] ss:$0 sm:$0xff]  ;;  %v72_v2 = vld [vmem:[#allocation3 + $0x8] sm:$0xff]  ;;  %s470_s10 = smov [#allocation9]  }
   0xf   :  { %v71_v1 = vld [vmem:[#allocation3] sm:$0xff]  ;;  %v73_v3 = vld [vmem:[#allocation3 + $0x10] sm:$0xff]  ;;  %v107_v5 = vmul.f32 %v513_v0, %v72_v2  ;;  %v74_v6 = vld [vmem:[#allocation3 + $0x18] sm:$0xff]  ;;  %s343_s11 = sshll.u32 %s470_s10, 4  ;;  %s345_s14 = sshll.u32 %s558_s5, 4  ;;  %s344_s11 = int_to_ptr.vmem [resolvable:$true] %s343_s11  ;;  %s346_s14 = int_to_ptr.hbm [resolvable:$true] %s345_s14 }
  0x10   :  { %v106_v4 = vmul.f32 %v513_v0, %v71_v1  ;;  %v138_v7 = vld [vmem:[#allocation6] sm:$0xff]  ;;  %v139_v8 = vld [vmem:[#allocation6 + $0x8] sm:$0xff]  ;;  %v108_v9 = vmul.f32 %v513_v0, %v73_v3  ;;  %v140_v11 = vld [vmem:[#allocation6 + $0x10] sm:$0xff]  ;;  %v109_v12 = vmul.f32 %v513_v0, %v74_v6 }
  0x11   :  { %v75_v10 = vld [vmem:[#allocation3 + $0x20] sm:$0xff]  ;;  %v171_v14 = vadd.f32 %v139_v8, %v107_v5  ;;  %v76_v15 = vld [vmem:[#allocation3 + $0x28] sm:$0xff]  ;;  %v141_v16 = vld [vmem:[#allocation6 + $0x18] sm:$0xff] }
  0x12   :  { %v170_v13 = vadd.f32 %v138_v7, %v106_v4  ;;  %v110_v17 = vmul.f32 %v513_v0, %v75_v10  ;;  %v172_v18 = vadd.f32 %v140_v11, %v108_v9  ;;  %v77_v19 = vld [vmem:[#allocation3 + $0x30] sm:$0xff]  ;;  %v142_v20 = vld [vmem:[#allocation6 + $0x20] sm:$0xff]  ;;  %v78_v21 = vld [vmem:[#allocation3 + $0x38] sm:$0xff]  ;;  %v111_v22 = vmul.f32 %v513_v0, %v76_v15 }
  0x13   :  { %v173_v23 = vadd.f32 %v141_v16, %v109_v12  ;;  %v203_v25 = vmax.f32 %v171_v14, 0.0  ;;  %v143_v26 = vld [vmem:[#allocation6 + $0x28] sm:$0xff]  ;;  %v234_v27 = vld [vmem:[#allocation8] sm:$0xff]  ;;  %v112_v29 = vmul.f32 %v513_v0, %v77_v19  ;;  %v113_v33 = vmul.f32 %v513_v0, %v78_v21  ;;  %v144_v34 = vld [vmem:[#allocation6 + $0x30] sm:$0xff] }
  0x14   :  { %v202_v24 = vmax.f32 %v170_v13, 0.0  ;;  %v235_v28 = vld [vmem:[#allocation8 + $0x8] sm:$0xff]  ;;  %v174_v30 = vadd.f32 %v142_v20, %v110_v17  ;;  %v204_v31 = vmax.f32 %v172_v18, 0.0  ;;  %v79_v32 = vld [vmem:[#allocation3 + $0x40] sm:$0xff]  ;;  %v236_v35 = vld [vmem:[#allocation8 + $0x10] sm:$0xff]  ;;  %v175_v37 = vadd.f32 %v143_v26, %v111_v22 }
  0x15   :  { %v80_v36 = vld [vmem:[#allocation3 + $0x48] sm:$0xff]  ;;  %v205_v38 = vmax.f32 %v173_v23, 0.0  ;;  %v267_v40 = vmul.f32 %v235_v28, %v203_v25  ;;  %v145_v41 = vld [vmem:[#allocation6 + $0x38] sm:$0xff]  ;;  %v81_v43 = vld [vmem:[#allocation3 + $0x50] sm:$0xff]  ;;  %v114_v44 = vmul.f32 %v513_v0, %v79_v32  ;;  %v176_v45 = vadd.f32 %v144_v34, %v112_v29 }
  0x16   :  { %v266_v39 = vmul.f32 %v234_v27, %v202_v24  ;;  %v237_v42 = vld [vmem:[#allocation8 + $0x18] sm:$0xff]  ;;  %v206_v46 = vmax.f32 %v174_v30, 0.0  ;;  %v268_v47 = vmul.f32 %v236_v35, %v204_v31  ;;  %v115_v48 = vmul.f32 %v513_v0, %v80_v36  ;;  %v146_v49 = vld [vmem:[#allocation6 + $0x40] sm:$0xff]  ;;  %v147_v57 = vld [vmem:[#allocation6 + $0x48] sm:$0xff] }
  0x17   :  { %v238_v50 = vld [vmem:[#allocation8 + $0x20] sm:$0xff]  ;;  %v82_v51 = vld [vmem:[#allocation3 + $0x58] sm:$0xff]  ;;  %v177_v52 = vadd.f32 %v145_v41, %v113_v33  ;;  %v207_v53 = vmax.f32 %v175_v37, 0.0  ;;  %v269_v54 = vmul.f32 %v237_v42, %v205_v38  ;;  %v116_v56 = vmul.f32 %v513_v0, %v81_v43  ;;  %v239_v58 = vld [vmem:[#allocation8 + $0x28] sm:$0xff] }
  0x18   :  { %v298_v55 = vadd.f32 %v267_v40, %v266_v39  ;;  %v83_v59 = vld [vmem:[#allocation3 + $0x60] sm:$0xff]  ;;  %v178_v60 = vadd.f32 %v146_v49, %v114_v44  ;;  %v208_v61 = vmax.f32 %v176_v45, 0.0  ;;  %v270_v62 = vmul.f32 %v238_v50, %v206_v46  ;;  %v148_v2 = vld [vmem:[#allocation6 + $0x50] sm:$0xff]  ;;  %v84_v4 = vld [vmem:[#allocation3 + $0x68] sm:$0xff] }
  0x19   :  { %v117_v1 = vmul.f32 %v513_v0, %v82_v51  ;;  %v240_v3 = vld [vmem:[#allocation8 + $0x30] sm:$0xff]  ;;  %v179_v5 = vadd.f32 %v147_v57, %v115_v48  ;;  %v209_v6 = vmax.f32 %v177_v52, 0.0  ;;  %v271_v7 = vmul.f32 %v239_v58, %v207_v53  ;;  %v149_v10 = vld [vmem:[#allocation6 + $0x58] sm:$0xff]  ;;  %v150_v18 = vld [vmem:[#allocation6 + $0x60] sm:$0xff] }
  0x1a   :  { %v299_v63 = vadd.f32 %v298_v55, %v268_v47  ;;  %v118_v9 = vmul.f32 %v513_v0, %v83_v59  ;;  %v241_v11 = vld [vmem:[#allocation8 + $0x38] sm:$0xff]  ;;  %v85_v12 = vld [vmem:[#allocation3 + $0x70] sm:$0xff]  ;;  %v180_v13 = vadd.f32 %v148_v2, %v116_v56  ;;  %v210_v14 = vmax.f32 %v178_v60, 0.0  ;;  %v242_v19 = vld [vmem:[#allocation8 + $0x40] sm:$0xff] }
  0x1b   :  { %v272_v15 = vmul.f32 %v240_v3, %v208_v61  ;;  %v119_v17 = vmul.f32 %v513_v0, %v84_v4  ;;  %v86_v20 = vld [vmem:[#allocation3 + $0x78] sm:$0xff]  ;;  %v181_v21 = vadd.f32 %v149_v10, %v117_v1  ;;  %v211_v22 = vmax.f32 %v179_v5, 0.0  ;;  %v151_v26 = vld [vmem:[#allocation6 + $0x68] sm:$0xff]  ;;  %v87_v28 = vld [vmem:[#allocation3 + $0x80] sm:$0xff] }
  0x1c   :  { %v300_v8 = vadd.f32 %v299_v63, %v269_v54  ;;  %v273_v23 = vmul.f32 %v241_v11, %v209_v6  ;;  %v120_v25 = vmul.f32 %v513_v0, %v85_v12  ;;  %v243_v27 = vld [vmem:[#allocation8 + $0x48] sm:$0xff]  ;;  %v182_v29 = vadd.f32 %v150_v18, %v118_v9  ;;  %v152_v34 = vld [vmem:[#allocation6 + $0x70] sm:$0xff]  ;;  %v153_v42 = vld [vmem:[#allocation6 + $0x78] sm:$0xff] }
  0x1d   :  { %v212_v30 = vmax.f32 %v180_v13, 0.0  ;;  %v274_v31 = vmul.f32 %v242_v19, %v210_v14  ;;  %v121_v33 = vmul.f32 %v513_v0, %v86_v20  ;;  %v244_v35 = vld [vmem:[#allocation8 + $0x50] sm:$0xff]  ;;  %v88_v36 = vld [vmem:[#allocation3 + $0x88] sm:$0xff]  ;;  %v183_v37 = vadd.f32 %v151_v26, %v119_v17  ;;  %v245_v43 = vld [vmem:[#allocation8 + $0x58] sm:$0xff] }
  0x1e   :  { %v301_v16 = vadd.f32 %v300_v8, %v270_v62  ;;  %v213_v38 = vmax.f32 %v181_v21, 0.0  ;;  %v275_v39 = vmul.f32 %v243_v27, %v211_v22  ;;  %v122_v41 = vmul.f32 %v513_v0, %v87_v28  ;;  %v89_v44 = vld [vmem:[#allocation3 + $0x90] sm:$0xff]  ;;  %v154_v50 = vld [vmem:[#allocation6 + $0x80] sm:$0xff]  ;;  %v90_v52 = vld [vmem:[#allocation3 + $0x98] sm:$0xff] }
  0x1f   :  { %v184_v45 = vadd.f32 %v152_v34, %v120_v25  ;;  %v214_v46 = vmax.f32 %v182_v29, 0.0  ;;  %v276_v47 = vmul.f32 %v244_v35, %v212_v30  ;;  %v123_v49 = vmul.f32 %v513_v0, %v88_v36  ;;  %v246_v51 = vld [vmem:[#allocation8 + $0x60] sm:$0xff]  ;;  %v155_v58 = vld [vmem:[#allocation6 + $0x88] sm:$0xff]  ;;  %v156_v3 = vld [vmem:[#allocation6 + $0x90] sm:$0xff] }
  0x20   :  { %v302_v24 = vadd.f32 %v301_v16, %v271_v7  ;;  %v185_v53 = vadd.f32 %v153_v42, %v121_v33  ;;  %v215_v54 = vmax.f32 %v183_v37, 0.0  ;;  %v277_v55 = vmul.f32 %v245_v43, %v213_v38  ;;  %v247_v59 = vld [vmem:[#allocation8 + $0x68] sm:$0xff]  ;;  %v91_v60 = vld [vmem:[#allocation3 + $0xa0] sm:$0xff]  ;;  %v248_v4 = vld [vmem:[#allocation8 + $0x70] sm:$0xff] }
  0x21   :  { %v124_v57 = vmul.f32 %v513_v0, %v89_v44  ;;  %v186_v61 = vadd.f32 %v154_v50, %v122_v41  ;;  %v216_v62 = vmax.f32 %v184_v45, 0.0  ;;  %v278_v63 = vmul.f32 %v246_v51, %v214_v46  ;;  %v92_v5 = vld [vmem:[#allocation3 + $0xa8] sm:$0xff]  ;;  %v157_v11 = vld [vmem:[#allocation6 + $0x98] sm:$0xff]  ;;  %v93_v13 = vld [vmem:[#allocation3 + $0xb0] sm:$0xff] }
  0x22   :  { %v303_v32 = vadd.f32 %v302_v24, %v272_v15  ;;  %v125_v2 = vmul.f32 %v513_v0, %v90_v52  ;;  %v187_v6 = vadd.f32 %v155_v58, %v123_v49  ;;  %v217_v7 = vmax.f32 %v185_v53, 0.0  ;;  %v249_v12 = vld [vmem:[#allocation8 + $0x78] sm:$0xff]  ;;  %v158_v19 = vld [vmem:[#allocation6 + $0xa0] sm:$0xff]  ;;  %v159_v27 = vld [vmem:[#allocation6 + $0xa8] sm:$0xff] }
  0x23   :  { %v279_v8 = vmul.f32 %v247_v59, %v215_v54  ;;  %v126_v10 = vmul.f32 %v513_v0, %v91_v60  ;;  %v188_v14 = vadd.f32 %v156_v3, %v124_v57  ;;  %v218_v15 = vmax.f32 %v186_v61, 0.0  ;;  %v250_v20 = vld [vmem:[#allocation8 + $0x80] sm:$0xff]  ;;  %v94_v21 = vld [vmem:[#allocation3 + $0xb8] sm:$0xff]  ;;  %v251_v28 = vld [vmem:[#allocation8 + $0x88] sm:$0xff] }
  0x24   :  { %v304_v40 = vadd.f32 %v303_v32, %v273_v23  ;;  %v280_v16 = vmul.f32 %v248_v4, %v216_v62  ;;  %v127_v18 = vmul.f32 %v513_v0, %v92_v5  ;;  %v189_v22 = vadd.f32 %v157_v11, %v125_v2  ;;  %v95_v29 = vld [vmem:[#allocation3 + $0xc0] sm:$0xff]  ;;  %v160_v35 = vld [vmem:[#allocation6 + $0xb0] sm:$0xff]  ;;  %v96_v37 = vld [vmem:[#allocation3 + $0xc8] sm:$0xff] }
  0x25   :  { %v219_v23 = vmax.f32 %v187_v6, 0.0  ;;  %v281_v24 = vmul.f32 %v249_v12, %v217_v7  ;;  %v128_v26 = vmul.f32 %v513_v0, %v93_v13  ;;  %v190_v30 = vadd.f32 %v158_v19, %v126_v10  ;;  %v252_v36 = vld [vmem:[#allocation8 + $0x90] sm:$0xff]  ;;  %v161_v43 = vld [vmem:[#allocation6 + $0xb8] sm:$0xff]  ;;  %v162_v51 = vld [vmem:[#allocation6 + $0xc0] sm:$0xff] }
  0x26   :  { %v305_v48 = vadd.f32 %v304_v40, %v274_v31  ;;  %v220_v31 = vmax.f32 %v188_v14, 0.0  ;;  %v282_v32 = vmul.f32 %v250_v20, %v218_v15  ;;  %v129_v34 = vmul.f32 %v513_v0, %v94_v21  ;;  %v253_v44 = vld [vmem:[#allocation8 + $0x98] sm:$0xff]  ;;  %v97_v45 = vld [vmem:[#allocation3 + $0xd0] sm:$0xff]  ;;  %v254_v52 = vld [vmem:[#allocation8 + $0xa0] sm:$0xff] }
  0x27   :  { %v191_v38 = vadd.f32 %v159_v27, %v127_v18  ;;  %v283_v40 = vmul.f32 %v251_v28, %v219_v23  ;;  %v130_v42 = vmul.f32 %v513_v0, %v95_v29  ;;  %v192_v46 = vadd.f32 %v160_v35, %v128_v26  ;;  %v98_v53 = vld [vmem:[#allocation3 + $0xd8] sm:$0xff]  ;;  %v163_v59 = vld [vmem:[#allocation6 + $0xc8] sm:$0xff]  ;;  %v99_v61 = vld [vmem:[#allocation3 + $0xe0] sm:$0xff] }
  0x28   :  { %v306_v56 = vadd.f32 %v305_v48, %v275_v39  ;;  %v221_v39 = vmax.f32 %v189_v22, 0.0  ;;  %v284_v48 = vmul.f32 %v252_v36, %v220_v31  ;;  %v131_v50 = vmul.f32 %v513_v0, %v96_v37  ;;  %v255_v60 = vld [vmem:[#allocation8 + $0xa8] sm:$0xff]  ;;  %v164_v4 = vld [vmem:[#allocation6 + $0xd0] sm:$0xff]  ;;  %v165_v12 = vld [vmem:[#allocation6 + $0xd8] sm:$0xff] }
  0x29   :  { %v193_v54 = vadd.f32 %v161_v43, %v129_v34  ;;  %v132_v58 = vmul.f32 %v513_v0, %v97_v45  ;;  %v194_v62 = vadd.f32 %v162_v51, %v130_v42  ;;  %v133_v3 = vmul.f32 %v513_v0, %v98_v53  ;;  %v256_v5 = vld [vmem:[#allocation8 + $0xb0] sm:$0xff]  ;;  %v100_v6 = vld [vmem:[#allocation3 + $0xe8] sm:$0xff]  ;;  %v257_v13 = vld [vmem:[#allocation8 + $0xb8] sm:$0xff] }
  0x2a   :  { %v307_v1 = vadd.f32 %v306_v56, %v276_v47  ;;  %v222_v47 = vmax.f32 %v190_v30, 0.0  ;;  %v285_v56 = vmul.f32 %v253_v44, %v221_v39  ;;  %v195_v7 = vadd.f32 %v163_v59, %v131_v50  ;;  %v101_v14 = vld [vmem:[#allocation3 + $0xf0] sm:$0xff]  ;;  %v166_v20 = vld [vmem:[#allocation6 + $0xe0] sm:$0xff]  ;;  %v102_v22 = vld [vmem:[#allocation3 + $0xf8] sm:$0xff] }
  0x2b   :  { %v134_v11 = vmul.f32 %v513_v0, %v99_v61  ;;  %v196_v15 = vadd.f32 %v164_v4, %v132_v58  ;;  %v135_v19 = vmul.f32 %v513_v0, %v100_v6  ;;  %v258_v21 = vld [vmem:[#allocation8 + $0xc0] sm:$0xff]  ;;  %v197_v23 = vadd.f32 %v165_v12, %v133_v3  ;;  %v167_v28 = vld [vmem:[#allocation6 + $0xe8] sm:$0xff]  ;;  %v168_v35 = vld [vmem:[#allocation6 + $0xf0] sm:$0xff] }
  0x2c   :  { %v308_v9 = vadd.f32 %v307_v1, %v277_v55  ;;  %v223_v55 = vmax.f32 %v191_v38, 0.0  ;;  %v286_v1 = vmul.f32 %v254_v52, %v222_v47  ;;  %v136_v27 = vmul.f32 %v513_v0, %v101_v14  ;;  %v259_v29 = vld [vmem:[#allocation8 + $0xc8] sm:$0xff]  ;;  %v260_v36 = vld [vmem:[#allocation8 + $0xd0] sm:$0xff]  ;;  %v261_v42 = vld [vmem:[#allocation8 + $0xd8] sm:$0xff] }
  0x2d   :  { %v198_v30 = vadd.f32 %v166_v20, %v134_v11  ;;  %v228_v31 = vmax.f32 %v196_v15, 0.0  ;;  %v137_v34 = vmul.f32 %v513_v0, %v102_v22  ;;  %v199_v37 = vadd.f32 %v167_v28, %v135_v19  ;;  %v262_v47 = vld [vmem:[#allocation8 + $0xe0] sm:$0xff]  ;;  %v263_v52 = vld [vmem:[#allocation8 + $0xe8] sm:$0xff]  ;;  %v265_v59 = vld [vmem:[#allocation8 + $0xf8] sm:$0xff] }
  0x2e   :  { %v309_v17 = vadd.f32 %v308_v9, %v278_v63  ;;  %v224_v63 = vmax.f32 %v192_v46, 0.0  ;;  %v287_v9 = vmul.f32 %v255_v60, %v223_v55  ;;  %v229_v38 = vmax.f32 %v197_v23, 0.0  ;;  %v264_v55 = vld [vmem:[#allocation8 + $0xf0] sm:$0xff] }
  0x2f   :  { %v200_v43 = vadd.f32 %v168_v35, %v136_v27  ;;  %v230_v44 = vmax.f32 %v198_v30, 0.0  ;;  %v292_v45 = vmul.f32 %v260_v36, %v228_v31 }
  0x30   :  { %v310_v25 = vadd.f32 %v309_v17, %v279_v8  ;;  %v225_v8 = vmax.f32 %v193_v54, 0.0  ;;  %v288_v17 = vmul.f32 %v256_v5, %v224_v63  ;;  %v293_v50 = vmul.f32 %v261_v42, %v229_v38 }
  0x31   :  { %v232_v53 = vmax.f32 %v200_v43, 0.0  ;;  %v294_v0 = vmul.f32 %v262_v47, %v230_v44 }
  0x32   :  { %v311_v33 = vadd.f32 %v310_v25, %v280_v16  ;;  %v226_v16 = vmax.f32 %v194_v62, 0.0  ;;  %v289_v25 = vmul.f32 %v257_v13, %v225_v8  ;;  %v335_v8 = vstv %s557_s4 }
  0x33   :  { %v296_v60 = vmul.f32 %v264_v55, %v232_v53 }
  0x34   :  { %v312_v41 = vadd.f32 %v311_v33, %v281_v24  ;;  %v227_v24 = vmax.f32 %v195_v7, 0.0 }
  0x36   :  { %v313_v49 = vadd.f32 %v312_v41, %v282_v32  ;;  %v290_v32 = vmul.f32 %v258_v21, %v226_v16  ;;  %v291_v39 = vmul.f32 %v259_v29, %v227_v24  ;;  %v169_v41 = vld [vmem:[#allocation6 + $0xf8] sm:$0xff] }
  0x38   :  { %v314_v57 = vadd.f32 %v313_v49, %v283_v40  ;;  %v231_v49 = vmax.f32 %v199_v37, 0.0 }
  0x3a   :  { %v315_v2 = vadd.f32 %v314_v57, %v284_v48  ;;  %v201_v48 = vadd.f32 %v169_v41, %v137_v34  ;;  %v295_v57 = vmul.f32 %v263_v52, %v231_v49 }
  0x3c   :  { %v316_v10 = vadd.f32 %v315_v2, %v285_v56  ;;  %v233_v56 = vmax.f32 %v201_v48, 0.0 }
  0x3e   :  { %v317_v18 = vadd.f32 %v316_v10, %v286_v1  ;;  %v297_v62 = vmul.f32 %v265_v59, %v233_v56 }
  0x40   :  { %v318_v26 = vadd.f32 %v317_v18, %v287_v9 }
  0x42   :  { %v319_v33 = vadd.f32 %v318_v26, %v288_v17 }
  0x44   :  { %v320_v40 = vadd.f32 %v319_v33, %v289_v25 }
  0x46   :  { %v321_v46 = vadd.f32 %v320_v40, %v290_v32 }
  0x48   :  { %v322_v51 = vadd.f32 %v321_v46, %v291_v39 }
  0x4a   :  { %v323_v54 = vadd.f32 %v322_v51, %v292_v45 }
  0x4c   :  { %v324_v58 = vadd.f32 %v323_v54, %v293_v50 }
  0x4e   :  { %v325_v61 = vadd.f32 %v324_v58, %v294_v0 }
  0x50   :  { %v326_v63 = vadd.f32 %v325_v61, %v295_v57 }
  0x52   :  { %v327_v1 = vadd.f32 %v326_v63, %v296_v60 }
  0x54   :  { %v328_v2 = vadd.f32 %v327_v1, %v297_v62 }
  0x56   :  { %v329_v3 = vrot.slane %v328_v2, 4 }
  0x58   :  { %v330_v4 = vadd.f32 %v329_v3, %v328_v2 }
  0x5a   :  { %v331_v5 = vrot.slane %v330_v4, 2 }
  0x5c   :  { %v332_v6 = vadd.f32 %v331_v5, %v330_v4 }
  0x5e   :  { %v333_v7 = vrot.slane %v332_v6, 1 }
  0x60   :  { %v334_v9 = vadd.f32 %v333_v7, %v332_v6 }
  0x62   :  { %v336_v10 = vadd.f32 %v335_v8, %v334_v9 }
  0x64   :  { %337 = vst [vmem:[#allocation9] sm:$0x1] %v336_v10 }
  0x65   :  { %348 = dma.vmem_to_hbm [thread:$0]  %s344_s11, 16, %s346_s14, [#allocation5]  }
  0x66   :  { %463 = dma.done.wait [#allocation5], 16  }
  0x67   :  { %464 = vsyncadd [#allocation5], 4294967280 }
  0x68   :  { %353 = vsyncpa [#allocation4], 1 }
  0x69   :  { %354 = vsyncpa [#allocation7], 1 }
  0x6a   :  { %355 = vsyncpa [#allocation5], 1 }

</bundles_post_ra>
